<compile_context>
chip_gen: v7x
topology: tpu7x:2x2x1
jax: 0.10.0
libtpu: 0.0.40
codegen_flags: <defaults>
</compile_context>

<pallas_src>
import math
from typing import NamedTuple, Optional, Tuple

import jax
import jax.numpy as jnp
from jax.experimental import pallas as pl
from jax.experimental.pallas import tpu as pltpu


class ModulationOut(NamedTuple):
    shift: jax.Array
    scale: jax.Array
    gate: jax.Array

    def modulate(self, x):
        return (1.0 + self.scale) * x + self.shift


# ----------------------------- Pallas kernel -----------------------------

def _silu_linear_kernel(x_ref, w_ref, b_ref, o_ref):
    """o = silu(x) @ w + b for one (tm, tn) output tile; K is un-tiled."""
    x = x_ref[...].astype(jnp.float32)
    x = x * jax.nn.sigmoid(x)                              # SiLU (EUP), fp32 (v5e-safe)
    acc = jnp.dot(x.astype(w_ref.dtype), w_ref[...],
                  preferred_element_type=jnp.float32)      # MXU, fp32 accumulate
    o_ref[...] = (acc + b_ref[...].astype(jnp.float32)).astype(o_ref.dtype)


# ----------------------------- tiling helpers -----------------------------

def _tpu_generation() -> str:
    try:
        kind = jax.devices()[0].device_kind.lower()
    except Exception:
        kind = ""
    if "v5 lite" in kind or "v5e" in kind or "v5litepod" in kind:
        return "v5e"
    if "v6" in kind:
        return "v6e"
    if "v7" in kind:
        return "v7x"
    return "other"


def _largest_dividing_tile(dim: int, cap: int, align: int) -> int:
    """Largest multiple of `align` that divides `dim` and is <= cap (full dim if
    `dim` is not a multiple of `align` — a full-extent block is always legal)."""
    if dim % align != 0:
        return dim
    t = min(dim, max(align, (cap // align) * align))
    while dim % t:
        t -= align
    return t


# ----------------------------- wrappers -----------------------------

def silu_linear(x, w, b, *, out_dtype=None):
    """Fused SiLU(x) @ w + b.  `w` is used in whatever dtype it already has
    (store it in bf16 once at param-init time; no per-call convert here)."""
    M, K = x.shape
    Kw, N = w.shape
    assert K == Kw and b.shape == (N,)
    out_dtype = out_dtype if out_dtype is not None else x.dtype

    gen = _tpu_generation()
    # Per-buffer weight-tile byte budget (double-buffered by the pipeline).
    w_tile_budget = {"v5e": 6 << 20, "v6e": 25 << 20, "v7x": 13 << 20}.get(gen, 13 << 20)

    w_isz = jnp.dtype(w.dtype).itemsize
    x_isz = jnp.dtype(x.dtype).itemsize
    o_isz = jnp.dtype(out_dtype).itemsize

    tn_cap = max(256, w_tile_budget // max(1, K * w_isz))
    if N % 256 == 0:
        tn = _largest_dividing_tile(N, tn_cap, 256)
    elif N % 128 == 0:
        tn = _largest_dividing_tile(N, tn_cap, 128)
    else:
        tn = N                                            # full extent: always legal
    tm = M if M <= 512 else 256                            # tiny-batch layer; cap rows

    grid = (pl.cdiv(N, tn), pl.cdiv(M, tm))                # N-blocks leading (megacore)

    # Explicit VMEM budget: double-buffered x/W/bias/out tiles + headroom.
    vmem_need = 2 * (tm * K * x_isz + K * tn * w_isz + tn * 4 + tm * tn * o_isz)
    vmem_cap = (60 << 20) if gen in ("v7x", "other") else (100 << 20)
    vmem_limit = min(vmem_cap, max(32 << 20, int(vmem_need * 1.25) + (2 << 20)))

    cost = pl.CostEstimate(
        flops=2 * M * K * N,
        transcendentals=M * K,
        bytes_accessed=(w.size * w_isz + x.size * x_isz
                        + b.size * jnp.dtype(b.dtype).itemsize + M * N * o_isz),
    )

    return pl.pallas_call(
        _silu_linear_kernel,
        out_shape=jax.ShapeDtypeStruct((M, N), out_dtype),
        grid=grid,
        in_specs=[
            pl.BlockSpec((tm, K), lambda j, i: (i, 0)),
            pl.BlockSpec((K, tn), lambda j, i: (0, j)),
            pl.BlockSpec((1, tn), lambda j, i: (0, j)),
        ],
        out_specs=pl.BlockSpec((tm, tn), lambda j, i: (i, j)),
        compiler_params=pltpu.CompilerParams(
            dimension_semantics=("parallel", "parallel"),
            vmem_limit_bytes=vmem_limit),
        cost_estimate=cost,
    )(x, w, b.reshape(1, N))


def init_modulation_params(key, dim: int, double: bool,
                           compute_dtype=jnp.bfloat16):
    """nn.Linear-style init; weight is converted to `compute_dtype` ONCE here so
    the forward never emits a per-call convert (the perf-critical fix)."""
    mult = 6 if double else 3
    k_w, k_b = jax.random.split(key)
    bound = 1.0 / math.sqrt(dim)
    w = jax.random.uniform(k_w, (dim, mult * dim), jnp.float32, -bound, bound)
    b = jax.random.uniform(k_b, (mult * dim,), jnp.float32, -bound, bound)
    return w.astype(compute_dtype), b                      # bias stays fp32 (epilogue add)


def modulation_forward(vec, w, b, *, double: bool
                       ) -> Tuple[ModulationOut, Optional[ModulationOut]]:
    """Equivalent of Modulation.forward: linear(silu(vec)[:, None, :]).chunk(mult)."""
    B, D = vec.shape
    mult = 6 if double else 3
    assert w.shape == (D, mult * D) and b.shape == (mult * D,)

    out = silu_linear(vec, w, b)                           # [B, mult*D]
    out = out[:, None, :]                                  # [B, 1, mult*D]
    # TODO(synk): the unsqueeze + chunk + ModulationOut packaging is zero-compute
    # JAX glue (pure reshapes/slices), not a Pallas kernel.
    chunks = jnp.split(out, mult, axis=-1)                 # mult x [B, 1, D]
    first = ModulationOut(*chunks[:3])
    second = ModulationOut(*chunks[3:]) if double else None
    return first, second


# ----------------------------- demo -----------------------------

if __name__ == "__main__":
    B, D = 2, 128
    double = True
    mult = 6 if double else 3

    key = jax.random.PRNGKey(0)
    k_vec, k_params = jax.random.split(key)
    vec = jax.random.normal(k_vec, (B, D), jnp.float32)
    # Weight converted to bf16 once, outside the forward.
    w_bf16, b = init_modulation_params(k_params, D, double)

    mod1, mod2 = modulation_forward(vec, w_bf16, b, double=double)
    jax.block_until_ready((mod1, mod2))
    assert mod1.shift.shape == (B, 1, D) and mod2 is not None

    # Reference using the same bf16-feed / fp32-accumulate recipe.
    # NOTE: vs a pure-fp32 PyTorch Linear this loses bf16 weight precision — the
    # intended trade-off for a bandwidth-bound modulation layer.
    xs = vec * jax.nn.sigmoid(vec)
    ref = (jnp.dot(xs.astype(jnp.bfloat16), w_bf16,
                   preferred_element_type=jnp.float32) + b).astype(vec.dtype)
    ref = ref[:, None, :]
    want = jnp.concatenate(jnp.split(ref, mult, axis=-1), axis=-1)
    got = jnp.concatenate([mod1.shift, mod1.scale, mod1.gate,
                           mod2.shift, mod2.scale, mod2.gate], axis=-1)
    assert jnp.allclose(got, want, atol=5e-3, rtol=5e-3), \
        float(jnp.max(jnp.abs(got - want)))

    # single-modulation (double=False) path
    s1, s2 = modulation_forward(vec, w_bf16[:, :3 * D], b[:3 * D], double=False)
    jax.block_until_ready(s1)
    assert s2 is None and s1.gate.shape == (B, 1, D)

    print("KERNEL_OK")
</pallas_src>

<mosaic_0001>
module attributes {stable_mosaic.version = 11 : i64} {
  func.func @_silu_linear_kernel(%arg0: i32, %arg1: i32, %arg2: memref<2x128xf32, #tpu.memory_space<vmem>>, %arg3: memref<128x768xbf16, #tpu.memory_space<vmem>>, %arg4: memref<1x768xf32, #tpu.memory_space<vmem>>, %arg5: memref<2x768xf32, #tpu.memory_space<vmem>>) attributes {dimension_semantics = [#tpu.dimension_semantics<parallel>, #tpu.dimension_semantics<parallel>], iteration_bounds = array<i64: 1, 1>, scalar_prefetch = 0 : i64, scratch_operands = 0 : i64, tpu.core_type = #tpu.core_type<tc>, window_params = [{transform_indices = @transform_0, window_bounds = array<i64: 2, 128>}, {transform_indices = @transform_1, window_bounds = array<i64: 128, 768>}, {transform_indices = @transform_2, window_bounds = array<i64: 1, 768>}, {transform_indices = @transform_3, window_bounds = array<i64: 2, 768>}]} {
    %c0 = arith.constant 0 : index
    %c0_0 = arith.constant 0 : index
    %0 = vector.load %arg2[%c0, %c0_0] : memref<2x128xf32, #tpu.memory_space<vmem>>, vector<2x128xf32>
    %1 = arith.negf %0 : vector<2x128xf32>
    %2 = math.exp %1 : vector<2x128xf32>
    %cst = arith.constant 1.000000e+00 : f32
    %3 = vector.broadcast %cst : f32 to vector<2x128xf32>
    %4 = arith.addf %3, %2 : vector<2x128xf32>
    %5 = arith.divf %3, %4 : vector<2x128xf32>
    %6 = arith.mulf %0, %5 : vector<2x128xf32>
    %7 = arith.truncf %6 : vector<2x128xf32> to vector<2x128xbf16>
    %c0_1 = arith.constant 0 : index
    %c0_2 = arith.constant 0 : index
    %8 = vector.load %arg3[%c0_1, %c0_2] : memref<128x768xbf16, #tpu.memory_space<vmem>>, vector<128x768xbf16>
    %cst_3 = arith.constant dense<0.000000e+00> : vector<2x768xf32>
    %9 = tpu.matmul %7, %8, %cst_3 {dimension_numbers = #tpu.dot_dimension_numbers<[1], [0], [0], [1], [0, 0, 1, 1], [], []>} : vector<2x128xbf16>, vector<128x768xbf16>, vector<2x768xf32> -> vector<2x768xf32>
    %c0_4 = arith.constant 0 : index
    %c0_5 = arith.constant 0 : index
    %10 = vector.load %arg4[%c0_4, %c0_5] : memref<1x768xf32, #tpu.memory_space<vmem>>, vector<1x768xf32>
    %11 = vector.broadcast %10 : vector<1x768xf32> to vector<2x768xf32>
    %12 = arith.addf %9, %11 : vector<2x768xf32>
    %c0_6 = arith.constant 0 : index
    %c0_7 = arith.constant 0 : index
    %13 = vector.load %arg5[%c0_6, %c0_7] : memref<2x768xf32, #tpu.memory_space<vmem>>, vector<2x768xf32>
    tpu.vector_store %arg5[%c0_6, %c0_7], %12 {strides = array<i32>} : memref<2x768xf32, #tpu.memory_space<vmem>>, vector<2x768xf32>,
    return
  }
  func.func @transform_0(%arg0: i32, %arg1: i32) -> (i32, i32) {
    %c0_i32 = arith.constant 0 : i32
    %c0_i32_0 = arith.constant 0 : i32
    return %arg1, %c0_i32 : i32, i32
  }
  func.func @transform_1(%arg0: i32, %arg1: i32) -> (i32, i32) {
    %c0_i32 = arith.constant 0 : i32
    %c0_i32_0 = arith.constant 0 : i32
    return %c0_i32, %arg0 : i32, i32
  }
  func.func @transform_2(%arg0: i32, %arg1: i32) -> (i32, i32) {
    %c0_i32 = arith.constant 0 : i32
    %c0_i32_0 = arith.constant 0 : i32
    return %c0_i32, %arg0 : i32, i32
  }
  func.func @transform_3(%arg0: i32, %arg1: i32) -> (i32, i32) {
    %c0_i32 = arith.constant 0 : i32
    return %arg1, %arg0 : i32, i32
  }
}

</mosaic_0001>

<bundles_post_ra>
// kernel: tpu_custom_call.1
= control target key start
LH: loop header
LB: loop body
LE: loop exit
PB: predicated region body
PF: predicated region fallthrough
CT: control target
= control target key end

     0   :  { %8 = vsyncpa [#allocation3], 0  ;;  %s826_s0 = inlined_call_operand.hbm [shape: f32[2,128], index: 0, kind: input, shape index: {}]   ;;  %s827_s1 = inlined_call_operand.hbm [shape: bf16[128,768], index: 1, kind: input, shape index: {}]   ;;  %s828_s2 = inlined_call_operand.vmem [shape: f32[1,768], index: 2, kind: input, shape index: {}]   ;;  %s829_s3 = inlined_call_operand.hbm [shape: f32[2,768], index: 3, kind: output, shape index: {}]  }
   0x1   :  { %9 = vsyncpa [#allocation6], 0 }
   0x2   :  { %10 = vsyncpa [#allocation4], 0  ;;  %s750_s12 = smov [#allocation2]   ;;  %s751_s14 = smov [#allocation5]  }
   0x3   :  { %s17_s13 = sshll.u32 %s750_s12, 4  ;;  %s26_s15 = sshll.u32 %s751_s14, 4  ;;  %s18_s13 = int_to_ptr.vmem [resolvable:$true] %s17_s13  ;;  %s777_s15 = int_to_ptr.vmem [resolvable:$true] %s26_s15 }
   0x4   :  { %s678_s18 = scalar_lea.hbm %s826_s0, 32 }
   0x5   :  { %p679_p0 = scmp.ne.s32.totalorder %s826_s0, %s678_s18  ;;  %p682_p1 = scmp.lt.u32.totalorder %s678_s18, %s826_s0 }
   0x7   :  { %p684_p2 = pnand %p682_p1, %p679_p0 }
   0x9   :  { %687 = shalt.err (!%p684_p2)
}
   0xa   :  { %s688_s23 = scalar_lea.vmem %s18_s13, 32  ;;  %p693_p4 = scmp.lt.s32.totalorder %s18_s13, %s18_s13 }
   0xb   :  { %p689_p3 = scmp.ne.s32.totalorder %s18_s13, %s688_s23  ;;  %p694_p5 = scmp.lt.s32.totalorder %s688_s23, %s688_s23 }
   0xd   :  { %p695_p6 = por %p694_p5, %p693_p4 }
   0xf   :  { %p696_p7 = pnand %p695_p6, %p689_p3 }
  0x11   :  { %699 = shalt.err (!%p696_p7)
}
  0x12   :  { %20 = dma.hbm_to_vmem [thread:$0]  %s826_s0, 32, %s18_s13, [#allocation3]  }
  0x13   :  { %s700_s28 = scalar_lea.hbm %s827_s1, 6144 }
  0x14   :  { %p701_p8 = scmp.ne.s32.totalorder %s827_s1, %s700_s28  ;;  %p704_p9 = scmp.lt.u32.totalorder %s700_s28, %s827_s1 }
  0x16   :  { %p706_p10 = pnand %p704_p9, %p701_p8 }
  0x18   :  { %709 = shalt.err (!%p706_p10)
}
  0x19   :  { %s710_s6 = scalar_lea.vmem %s777_s15, 6144  ;;  %p715_p12 = scmp.lt.s32.totalorder %s777_s15, %s777_s15 }
  0x1a   :  { %p711_p11 = scmp.ne.s32.totalorder %s777_s15, %s710_s6  ;;  %p716_p13 = scmp.lt.s32.totalorder %s710_s6, %s710_s6 }
  0x1c   :  { %p717_p0 = por %p716_p13, %p715_p12 }
  0x1e   :  { %p718_p1 = pnand %p717_p0, %p711_p11 }
  0x20   :  { %721 = shalt.err (!%p718_p1)
}
  0x21   :  { %s752_s0 = smov 384   ;;  %s753_s7 = smov 24  }
  0x22   :  { %32 = dma.hbm_to_vmem [thread:$0]  %s827_s1, 6144, %s777_s15, [#allocation6], %s752_s0, %s752_s0, %s753_s7  }
  0x23   :  { %744 = dma.done.wait [#allocation3], 32  }
  0x24   :  { %745 = vsyncadd [#allocation3], 4294967264 }
  0x25   :  { %746 = dma.done.wait [#allocation6], 6144  }
  0x26   :  { %747 = vsyncadd [#allocation6], 4294961152  ;;  %v754_v0 = vmov 0   ;;  %v602_v1 = vld [vmem:[#allocation5 + $0x4] ss:$24 sps:$4 sm:$0xff]   ;;  %v101_v56 = vlaneseq }
  0x27   :  { %403 = vmatprep.mubr.bf16.mxu0 %v754_v0  ;;  %444 = vmatprep.mubr.bf16.mxu1 %v754_v0  ;;  %v604_v2 = vld [vmem:[#allocation5 + $0xc] ss:$24 sps:$4 sm:$0xff]   ;;  %v606_v3 = vld [vmem:[#allocation5] ss:$24 sps:$4 sm:$0xff]   ;;  %v610_v6 = vld [vmem:[#allocation5 + $0x3c] ss:$24 sps:$4 sm:$0xff]  }
  0x28   :  { %371 = vmatprep.subr.bf16.mxu0 %v602_v1  ;;  %v607_v4 = vld [vmem:[#allocation5 + $0x8] ss:$24 sps:$4 sm:$0xff]   ;;  %412 = vmatprep.subr.bf16.mxu1 %v604_v2  ;;  %v608_v5 = vld [vmem:[#allocation5 + $0x34] ss:$24 sps:$4 sm:$0xff]   ;;  %v613_v8 = vld [vmem:[#allocation5 + $0x38] ss:$24 sps:$4 sm:$0xff]  }
  0x29   :  { %372 = vmatpush1.bf16.msra.mxu0 %v606_v3  ;;  %413 = vmatpush1.bf16.msra.mxu1 %v607_v4  ;;  %v612_v7 = vld [vmem:[#allocation5 + $0x30] ss:$24 sps:$4 sm:$0xff]   ;;  %v614_v9 = vld [vmem:[#allocation5 + $0x64] ss:$24 sps:$4 sm:$0xff]   ;;  %v618_v11 = vld [vmem:[#allocation5 + $0x60] ss:$24 sps:$4 sm:$0xff]  }
  0x2a   :  { %373 = vmatprep.subr.bf16.mxu0 %v608_v5  ;;  %414 = vmatprep.subr.bf16.mxu1 %v610_v6  ;;  %v616_v10 = vld [vmem:[#allocation5 + $0x6c] ss:$24 sps:$4 sm:$0xff]   ;;  %v619_v12 = vld [vmem:[#allocation5 + $0x68] ss:$24 sps:$4 sm:$0xff]   ;;  %v622_v14 = vld [vmem:[#allocation5 + $0x9c] ss:$24 sps:$4 sm:$0xff]  }
  0x2b   :  { %v620_v13 = vld [vmem:[#allocation5 + $0x94] ss:$24 sps:$4 sm:$0xff]   ;;  %v624_v15 = vld [vmem:[#allocation5 + $0x90] ss:$24 sps:$4 sm:$0xff]   ;;  %v626_v17 = vld [vmem:[#allocation5 + $0xc4] ss:$24 sps:$4 sm:$0xff]  }
  0x2c   :  { %v625_v16 = vld [vmem:[#allocation5 + $0x98] ss:$24 sps:$4 sm:$0xff]   ;;  %v628_v18 = vld [vmem:[#allocation5 + $0xcc] ss:$24 sps:$4 sm:$0xff]   ;;  %v631_v20 = vld [vmem:[#allocation5 + $0xc8] ss:$24 sps:$4 sm:$0xff]  }
  0x2d   :  { %374 = vmatpush1.bf16.msra.mxu0 %v612_v7  ;;  %415 = vmatpush1.bf16.msra.mxu1 %v613_v8  ;;  %v630_v19 = vld [vmem:[#allocation5 + $0xc0] ss:$24 sps:$4 sm:$0xff]   ;;  %v632_v21 = vld [vmem:[#allocation5 + $0xf4] ss:$24 sps:$4 sm:$0xff]   ;;  %v636_v23 = vld [vmem:[#allocation5 + $0xf0] ss:$24 sps:$4 sm:$0xff]  }
  0x2e   :  { %375 = vmatprep.subr.bf16.mxu0 %v614_v9  ;;  %416 = vmatprep.subr.bf16.mxu1 %v616_v10  ;;  %v634_v22 = vld [vmem:[#allocation5 + $0xfc] ss:$24 sps:$4 sm:$0xff]   ;;  %v637_v24 = vld [vmem:[#allocation5 + $0xf8] ss:$24 sps:$4 sm:$0xff]   ;;  %v640_v26 = vld [vmem:[#allocation5 + $0x12c] ss:$24 sps:$4 sm:$0xff]  }
  0x2f   :  { %v638_v25 = vld [vmem:[#allocation5 + $0x124] ss:$24 sps:$4 sm:$0xff]   ;;  %v642_v29 = vld [vmem:[#allocation5 + $0x120] ss:$24 sps:$4 sm:$0xff]   ;;  %v644_v31 = vld [vmem:[#allocation5 + $0x154] ss:$24 sps:$4 sm:$0xff]  }
  0x30   :  { %v42_v27 = vld [vmem:[#allocation2] sm:$0x3]  ;;  %v643_v30 = vld [vmem:[#allocation5 + $0x128] ss:$24 sps:$4 sm:$0xff]   ;;  %v649_v34 = vld [vmem:[#allocation5 + $0x158] ss:$24 sps:$4 sm:$0xff]  }
  0x31   :  { %376 = vmatpush1.bf16.msra.mxu0 %v618_v11  ;;  %417 = vmatpush1.bf16.msra.mxu1 %v619_v12  ;;  %v545_v28 = vmul.f32 -1.442695, %v42_v27  ;;  %v646_v32 = vld [vmem:[#allocation5 + $0x15c] ss:$24 sps:$4 sm:$0xff]   ;;  %v648_v33 = vld [vmem:[#allocation5 + $0x150] ss:$24 sps:$4 sm:$0xff]  }
  0x32   :  { %377 = vmatprep.subr.bf16.mxu0 %v620_v13  ;;  %418 = vmatprep.subr.bf16.mxu1 %v622_v14  ;;  %v652_v35 = vld [vmem:[#allocation5 + $0x14] ss:$24 sps:$4 sm:$0xff]   ;;  %v650_v40 = vld [vmem:[#allocation5 + $0x10] ss:$24 sps:$4 sm:$0xff]   ;;  %v655_v42 = vld [vmem:[#allocation5 + $0x44] ss:$24 sps:$4 sm:$0xff]  }
  0x33   :  { %674 = vpow2.f32 %v545_v28  ;;  %v653_v43 = vld [vmem:[#allocation5 + $0x40] ss:$24 sps:$4 sm:$0xff]   ;;  %v658_v44 = vld [vmem:[#allocation5 + $0x74] ss:$24 sps:$4 sm:$0xff]   ;;  %v656_v45 = vld [vmem:[#allocation5 + $0x70] ss:$24 sps:$4 sm:$0xff]  }
  0x34   :  { %v661_v46 = vld [vmem:[#allocation5 + $0xa4] ss:$24 sps:$4 sm:$0xff]   ;;  %v659_v47 = vld [vmem:[#allocation5 + $0xa0] ss:$24 sps:$4 sm:$0xff]   ;;  %v664_v48 = vld [vmem:[#allocation5 + $0xd4] ss:$24 sps:$4 sm:$0xff]  }
  0x35   :  { %378 = vmatpush1.bf16.msra.mxu0 %v624_v15  ;;  %419 = vmatpush1.bf16.msra.mxu1 %v625_v16  ;;  %v662_v49 = vld [vmem:[#allocation5 + $0xd0] ss:$24 sps:$4 sm:$0xff]   ;;  %v667_v50 = vld [vmem:[#allocation5 + $0x104] ss:$24 sps:$4 sm:$0xff]   ;;  %v665_v51 = vld [vmem:[#allocation5 + $0x100] ss:$24 sps:$4 sm:$0xff]  }
  0x36   :  { %379 = vmatprep.subr.bf16.mxu0 %v626_v17  ;;  %420 = vmatprep.subr.bf16.mxu1 %v628_v18  ;;  %v670_v52 = vld [vmem:[#allocation5 + $0x134] ss:$24 sps:$4 sm:$0xff]   ;;  %v668_v53 = vld [vmem:[#allocation5 + $0x130] ss:$24 sps:$4 sm:$0xff]   ;;  %v673_v54 = vld [vmem:[#allocation5 + $0x164] ss:$24 sps:$4 sm:$0xff]  }
  0x37   :  { %v671_v55 = vld [vmem:[#allocation5 + $0x160] ss:$24 sps:$4 sm:$0xff]   ;;  %v102_v57 = vshrl.u32 %v101_v56, 7  ;;  %v755_v62 = vmov 1983009808  }
  0x38   :  { %v99_v60 = vld [vmem:[%s828_s2] sm:$0x3f]  ;;  %v503_v63 = vunpack.c.l.s4 %v755_v62  ;;  %s756_s2 = smov [#allocation7]  }
  0x39   :  { %380 = vmatpush1.bf16.msra.mxu0 %v630_v19  ;;  %421 = vmatpush1.bf16.msra.mxu1 %v631_v20  ;;  %v103_v58 = vsub.s32 0, %v102_v57  ;;  %v111_v59 = vsub.s32 2, %v102_v57  ;;  %v107_v61 = vsub.s32 1, %v102_v57  ;;  %s535_s11 = sshll.u32 %s756_s2, 4  ;;  %s536_s11 = int_to_ptr.vmem [resolvable:$true] %s535_s11 }
  0x3a   :  { %381 = vmatprep.subr.bf16.mxu0 %v632_v21  ;;  %422 = vmatprep.subr.bf16.mxu1 %v634_v22  ;;  %v504_v4 = vunpack.c.0.s8 %v503_v63  ;;  %s722_s12 = scalar_lea.vmem %s536_s11, 192  ;;  %p727_p3 = scmp.lt.s32.totalorder %s536_s11, %s536_s11 }
  0x3b   :  { %v104_v1 = vrot.slane %v99_v60, %v103_v58  ;;  %v112_v2 = vrot.slane %v99_v60, %v111_v59  ;;  %v108_v3 = vrot.slane %v99_v60, %v107_v61  ;;  %p723_p2 = scmp.ne.s32.totalorder %s536_s11, %s722_s12  ;;  %p728_p4 = scmp.lt.s32.totalorder %s722_s12, %s722_s12 }
  0x3c   :  { %v507_v13 = vsub.s32 %v504_v4, %v102_v57 }
  0x3d   :  { %382 = vmatpush1.bf16.msra.mxu0 %v636_v23  ;;  %423 = vmatpush1.bf16.msra.mxu1 %v637_v24  ;;  %v675_v36 = vpop.eup %674  ;;  %v119_v24 = vsub.s32 4, %v102_v57  ;;  %p729_p5 = por %p728_p4, %p727_p3 }
  0x3e   :  { %383 = vmatprep.subr.bf16.mxu0 %v638_v25  ;;  %424 = vmatprep.subr.bf16.mxu1 %v640_v26  ;;  %v46_v37 = vadd.f32 1.0, %v675_v36  ;;  %v123_v25 = vsub.s32 5, %v102_v57 }
  0x3f   :  { %v120_v26 = vrot.slane %v99_v60, %v119_v24  ;;  %p730_p6 = pnand %p729_p5, %p723_p2 }
  0x40   :  { %676 = vrcp.f32 %v46_v37 }
  0x41   :  { %384 = vmatpush1.bf16.msra.mxu0 %v642_v29  ;;  %425 = vmatpush1.bf16.msra.mxu1 %v643_v30 }
  0x42   :  { %385 = vmatprep.subr.bf16.mxu0 %v644_v31  ;;  %426 = vmatprep.subr.bf16.mxu1 %v646_v32 }
  0x45   :  { %386 = vmatpush1.bf16.msra.mxu0 %v648_v33  ;;  %427 = vmatpush1.bf16.msra.mxu1 %v649_v34 }
  0x46   :  { %453 = vmatprep.subr.bf16.mxu0 %v652_v35 }
  0x4a   :  { %v677_v38 = vpop.eup %676 }
  0x4b   :  { %v49_v39 = vmul.f32 %v677_v38, %v42_v27  ;;  %v124_v27 = vrot.slane %v99_v60, %v123_v25 }
  0x4d   :  { %v50_v41 = vpack.c.bf16 %v49_v39, %v49_v39 }
  0x4f   :  { %404 = vmatmul.mubr.bf16.vlgmr.msra.gmra.mrb[0].mxu0 %v50_v41  ;;  %445 = vmatmul.mubr.bf16.vlgmr.msra.gmra.mrb[0].mxu1 %v50_v41 }
  0x50   :  { %454 = vmatpush1.bf16.msra.mxu0 %v650_v40  ;;  %485 = vmatprep.mubr.bf16.mxu0 %v754_v0  ;;  %v115_v0 = vsub.s32 3, %v102_v57 }
  0x51   :  { %455 = vmatprep.subr.bf16.mxu0 %v655_v42 }
  0x52   :  { %v116_v5 = vrot.slane %v99_v60, %v115_v0 }
  0x54   :  { %456 = vmatpush1.bf16.msra.mxu0 %v653_v43 }
  0x55   :  { %457 = vmatprep.subr.bf16.mxu0 %v658_v44 }
  0x58   :  { %458 = vmatpush1.bf16.msra.mxu0 %v656_v45 }
  0x59   :  { %459 = vmatprep.subr.bf16.mxu0 %v661_v46 }
  0x5c   :  { %460 = vmatpush1.bf16.msra.mxu0 %v659_v47 }
  0x5d   :  { %461 = vmatprep.subr.bf16.mxu0 %v664_v48 }
  0x60   :  { %462 = vmatpush1.bf16.msra.mxu0 %v662_v49 }
  0x61   :  { %463 = vmatprep.subr.bf16.mxu0 %v667_v50 }
  0x64   :  { %464 = vmatpush1.bf16.msra.mxu0 %v665_v51 }
  0x65   :  { %465 = vmatprep.subr.bf16.mxu0 %v670_v52 }
  0x68   :  { %466 = vmatpush1.bf16.msra.mxu0 %v668_v53 }
  0x69   :  { %467 = vmatprep.subr.bf16.mxu0 %v673_v54 }
  0x6c   :  { %468 = vmatpush1.bf16.msra.mxu0 %v671_v55 }
  0x6f   :  { %486 = vmatmul.mubr.bf16.vlgmr.msra.gmra.mrb[4].mxu0 %v50_v41 }
 0x122   :  { %v405_v6 = vpop.f32.mrb[0].mxu0  ;;  %v446_v7 = vpop.f32.mrb[0].mxu1 }
 0x123   :  { %v406_v8 = vadd.f32 %v405_v6, %v104_v1  ;;  %v447_v9 = vadd.f32 %v446_v7, %v112_v2  ;;  %v407_v10 = vpop.f32.mrb[1].mxu0  ;;  %v448_v11 = vpop.f32.mrb[1].mxu1 }
 0x124   :  { %v408_v12 = vadd.f32 %v407_v10, %v108_v3  ;;  %v449_v14 = vadd.f32 %v448_v11, %v116_v5  ;;  %v409_v15 = vpop.f32.mrb[2].mxu0  ;;  %v450_v16 = vpop.f32.mrb[2].mxu1 }
 0x125   :  { %v410_v17 = vpop.f32.mrb[3].mxu0  ;;  %v451_v18 = vpop.f32.mrb[3].mxu1 }
 0x126   :  { %v500_v19 = vcombine.low %v406_v8, %v408_v12  ;;  %v501_v20 = vcombine.low %v447_v9, %v449_v14 }
 0x128   :  { %v508_v21 = vrot.slane %v500_v19, %v507_v13  ;;  %v515_v22 = vrot.slane %v501_v20, %v507_v13 }
 0x12a   :  { %v516_v23 = vcombine.low %v508_v21, %v515_v22 }
 0x12c   :  { %527 = vst [vmem:[#allocation7] sm:$0xff] %v516_v23 }
 0x142   :  { %v487_v28 = vpop.f32.mrb[4].mxu0 }
 0x143   :  { %v488_v29 = vadd.f32 %v487_v28, %v120_v26  ;;  %v489_v30 = vpop.f32.mrb[5].mxu0 }
 0x144   :  { %v490_v31 = vadd.f32 %v489_v30, %v124_v27  ;;  %v491_v32 = vpop.f32.mrb[6].mxu0 }
 0x145   :  { %v492_v33 = vpop.f32.mrb[7].mxu0 }
 0x146   :  { %v517_v34 = vcombine.low %v488_v29, %v490_v31 }
 0x148   :  { %594 = vst.sshfl [vmem:[#allocation7 + $0x8] sm:$0x33 pattern:$0x76325410] %v517_v34 }
 0x149   :  { %733 = shalt.err (!%p730_p6)
}
 0x14a   :  { %s734_s15 = scalar_lea.hbm %s829_s3, 192 }
 0x14b   :  { %p735_p7 = scmp.ne.s32.totalorder %s829_s3, %s734_s15  ;;  %p738_p8 = scmp.lt.u32.totalorder %s734_s15, %s829_s3 }
 0x14d   :  { %p740_p9 = pnand %p738_p8, %p735_p7 }
 0x14f   :  { %743 = shalt.err (!%p740_p9)
}
 0x150   :  { %538 = dma.vmem_to_hbm [thread:$0]  %s536_s11, 192, %s829_s3, [#allocation4]  }
 0x151   :  { %748 = dma.done.wait [#allocation4], 192  }
 0x152   :  { %749 = vsyncadd [#allocation4], 4294967104 }
 0x153   :  { %542 = vsyncpa [#allocation3], 1 }
 0x154   :  { %543 = vsyncpa [#allocation6], 1 }
 0x155   :  { %544 = vsyncpa [#allocation4], 1 }

</bundles_post_ra>
